<compile_context>
chip_gen: v7x
topology: tpu7x:2x2x1
jax: 0.10.0
libtpu: 0.0.40
codegen_flags: <defaults>
</compile_context>

<pallas_src>
import math
import jax
import jax.numpy as jnp
from jax.experimental import pallas as pl
from jax.experimental.pallas import tpu as pltpu

NEG_SLOPE = 0.01  # PyTorch nn.LeakyReLU default


def _leaky_relu(z):
    return jnp.where(z > 0, z, NEG_SLOPE * z)


def mlp_d_kernel(xt_ref,
                 w0_ref, b0_ref,
                 w1_ref, b1_ref,
                 w2_ref, b2_ref,
                 w3_ref, b3_ref,
                 o_ref):
    # xt_ref: (in_dim, bt) bf16   -- batch on the lane axis
    # wK_ref: (out_k, in_k) bf16  -- PyTorch-native orientation, so layer k is Wk @ H
    # bK_ref: (out_k, 1) f32      -- column bias, broadcast across lanes
    # o_ref : (1, bt) f32         -- lane-dense output row
    h = jnp.dot(w0_ref[...], xt_ref[...],
                preferred_element_type=jnp.float32) + b0_ref[...]
    h = _leaky_relu(h).astype(jnp.bfloat16)

    h = jnp.dot(w1_ref[...], h,
                preferred_element_type=jnp.float32) + b1_ref[...]
    h = _leaky_relu(h).astype(jnp.bfloat16)

    h = jnp.dot(w2_ref[...], h,
                preferred_element_type=jnp.float32) + b2_ref[...]
    h = _leaky_relu(h).astype(jnp.bfloat16)

    # Final Linear(128, 1): elementwise multiply (VPU) + sublane reduce (XLU)
    # instead of a degenerate 1-wide MXU matmul; result is naturally (1, bt).
    w3 = w3_ref[...].astype(jnp.float32)                       # (L, 1)
    out = jnp.sum(h.astype(jnp.float32) * w3, axis=0, keepdims=True)
    o_ref[...] = (out + b3_ref[...]).astype(o_ref.dtype)


def mlp_d_forward(x, params, *, batch_tile=512):
    """x: [B, input_size] float32. params: [W0,b0,W1,b1,W2,b2,W3,b3], W stored [in,out]."""
    B, in_dim = x.shape
    W0, b0, W1, b1, W2, b2, W3, b3 = params
    L = W0.shape[1]           # layer_size (128)

    if B <= batch_tile:
        bt = B                # single grid step; block == full array
        B_pad = B
    else:
        assert batch_tile % 128 == 0, "batch_tile must be a multiple of 128 (lane width)"
        bt = batch_tile
        B_pad = ((B + bt - 1) // bt) * bt

    # Batch on the lane axis; bf16 operands for the MXU (layout plumbing only).
    xt = x.T.astype(jnp.bfloat16)                 # (in_dim, B)
    if B_pad != B:
        xt = jnp.pad(xt, ((0, 0), (0, B_pad - B)))

    w0t = W0.T.astype(jnp.bfloat16)               # (L, in_dim)
    w1t = W1.T.astype(jnp.bfloat16)               # (L, L)
    w2t = W2.T.astype(jnp.bfloat16)               # (L, L)
    w3c = W3.astype(jnp.bfloat16)                 # (L, 1)
    b0c = b0.reshape(L, 1).astype(jnp.float32)
    b1c = b1.reshape(L, 1).astype(jnp.float32)
    b2c = b2.reshape(L, 1).astype(jnp.float32)
    b3c = b3.reshape(1, 1).astype(jnp.float32)

    grid = (B_pad // bt,)

    def rep(shape):  # weights/biases: same full block every grid step (VMEM resident)
        return pl.BlockSpec(shape, lambda i: (0,) * len(shape))

    flops = 2 * B_pad * (in_dim * L + 2 * L * L + L)
    bytes_accessed = int(xt.size * 2 + B_pad * 4
                         + (w0t.size + w1t.size + w2t.size + w3c.size) * 2
                         + (b0c.size + b1c.size + b2c.size + b3c.size) * 4)

    out_row = pl.pallas_call(
        mlp_d_kernel,
        out_shape=jax.ShapeDtypeStruct((1, B_pad), jnp.float32),
        grid_spec=pltpu.PrefetchScalarGridSpec(
            num_scalar_prefetch=0,
            grid=grid,
            in_specs=[
                pl.BlockSpec((in_dim, bt), lambda i: (0, i)),
                rep((L, in_dim)), rep((L, 1)),
                rep((L, L)),      rep((L, 1)),
                rep((L, L)),      rep((L, 1)),
                rep((L, 1)),      rep((1, 1)),
            ],
            out_specs=pl.BlockSpec((1, bt), lambda i: (0, i)),
        ),
        compiler_params=pltpu.CompilerParams(
            dimension_semantics=("parallel",)),
        cost_estimate=pl.CostEstimate(
            flops=flops, transcendentals=0, bytes_accessed=bytes_accessed),
    )(xt, w0t, b0c, w1t, b1c, w2t, b2c, w3c, b3c)

    return out_row[0, :B].reshape(B, 1).astype(x.dtype)


def init_mlp_d_params(key, input_size, layer_size=128, hidden_layers=3):
    """Mimics torch.nn.Linear default init (uniform +/- 1/sqrt(fan_in)).
    Weights stored [in, out] (transposed vs. PyTorch's [out, in])."""
    assert hidden_layers == 3, "kernel is written for the default 3 hidden layers"
    dims = [input_size] + [layer_size] * hidden_layers + [1]
    params = []
    for i in range(len(dims) - 1):
        key, kw, kb = jax.random.split(key, 3)
        fan_in = dims[i]
        bound = 1.0 / math.sqrt(fan_in)
        W = jax.random.uniform(kw, (dims[i], dims[i + 1]), jnp.float32, -bound, bound)
        b = jax.random.uniform(kb, (1, dims[i + 1]), jnp.float32, -bound, bound)
        params += [W, b]
    return params


def mlp_d_reference(x, params):
    W0, b0, W1, b1, W2, b2, W3, b3 = params
    h = _leaky_relu(x @ W0 + b0)
    h = _leaky_relu(h @ W1 + b1)
    h = _leaky_relu(h @ W2 + b2)
    return h @ W3 + b3


if __name__ == "__main__":
    key = jax.random.PRNGKey(0)
    k_x, k_p, k_x2 = jax.random.split(key, 3)

    batch = 16
    input_size = 32
    layer_size = 128
    hidden_layers = 3

    x = jax.random.normal(k_x, (batch, input_size), jnp.float32)
    params = init_mlp_d_params(k_p, input_size, layer_size, hidden_layers)

    # Single-tile path (block == full batch).
    out = jax.block_until_ready(mlp_d_forward(x, params))
    ref = mlp_d_reference(x, params)
    assert out.shape == (batch, 1), out.shape
    assert jnp.allclose(out, ref, atol=3e-2, rtol=3e-2), (
        "mismatch vs. reference, max err %f" % float(jnp.max(jnp.abs(out - ref))))

    # Multi-tile path (grid > 1, batch zero-padded to a multiple of batch_tile).
    batch2 = 300
    x2 = jax.random.normal(k_x2, (batch2, input_size), jnp.float32)
    out2 = jax.block_until_ready(mlp_d_forward(x2, params, batch_tile=128))
    ref2 = mlp_d_reference(x2, params)
    assert out2.shape == (batch2, 1), out2.shape
    assert jnp.allclose(out2, ref2, atol=3e-2, rtol=3e-2), (
        "mismatch vs. reference, max err %f" % float(jnp.max(jnp.abs(out2 - ref2))))

    print("KERNEL_OK")
</pallas_src>

<mosaic_0001>
module attributes {stable_mosaic.version = 11 : i64} {
  func.func @mlp_d_kernel(%arg0: i32, %arg1: memref<32x16xbf16, #tpu.memory_space<vmem>>, %arg2: memref<128x32xbf16, #tpu.memory_space<vmem>>, %arg3: memref<128x1xf32, #tpu.memory_space<vmem>>, %arg4: memref<128x128xbf16, #tpu.memory_space<vmem>>, %arg5: memref<128x1xf32, #tpu.memory_space<vmem>>, %arg6: memref<128x128xbf16, #tpu.memory_space<vmem>>, %arg7: memref<128x1xf32, #tpu.memory_space<vmem>>, %arg8: memref<128x1xbf16, #tpu.memory_space<vmem>>, %arg9: memref<1x1xf32, #tpu.memory_space<vmem>>, %arg10: memref<1x16xf32, #tpu.memory_space<vmem>>) attributes {dimension_semantics = [#tpu.dimension_semantics<parallel>], iteration_bounds = array<i64: 1>, scalar_prefetch = 0 : i64, scratch_operands = 0 : i64, tpu.core_type = #tpu.core_type<tc>, window_params = [{transform_indices = @transform_0, window_bounds = array<i64: 32, 16>}, {pipeline_mode = #tpu.pipeline_mode<synchronous>, transform_indices = @transform_1, window_bounds = array<i64: 128, 32>}, {pipeline_mode = #tpu.pipeline_mode<synchronous>, transform_indices = @transform_2, window_bounds = array<i64: 128, 1>}, {pipeline_mode = #tpu.pipeline_mode<synchronous>, transform_indices = @transform_3, window_bounds = array<i64: 128, 128>}, {pipeline_mode = #tpu.pipeline_mode<synchronous>, transform_indices = @transform_4, window_bounds = array<i64: 128, 1>}, {pipeline_mode = #tpu.pipeline_mode<synchronous>, transform_indices = @transform_5, window_bounds = array<i64: 128, 128>}, {pipeline_mode = #tpu.pipeline_mode<synchronous>, transform_indices = @transform_6, window_bounds = array<i64: 128, 1>}, {pipeline_mode = #tpu.pipeline_mode<synchronous>, transform_indices = @transform_7, window_bounds = array<i64: 128, 1>}, {pipeline_mode = #tpu.pipeline_mode<synchronous>, transform_indices = @transform_8, window_bounds = array<i64: 1, 1>}, {transform_indices = @transform_9, window_bounds = array<i64: 1, 16>}]} {
    %c0 = arith.constant 0 : index
    %c0_0 = arith.constant 0 : index
    %0 = vector.load %arg2[%c0, %c0_0] : memref<128x32xbf16, #tpu.memory_space<vmem>>, vector<128x32xbf16>
    %c0_1 = arith.constant 0 : index
    %c0_2 = arith.constant 0 : index
    %1 = vector.load %arg1[%c0_1, %c0_2] : memref<32x16xbf16, #tpu.memory_space<vmem>>, vector<32x16xbf16>
    %cst = arith.constant dense<0.000000e+00> : vector<128x16xf32>
    %2 = tpu.matmul %0, %1, %cst {dimension_numbers = #tpu.dot_dimension_numbers<[1], [0], [0], [1], [0, 0, 1, 1], [], []>} : vector<128x32xbf16>, vector<32x16xbf16>, vector<128x16xf32> -> vector<128x16xf32>
    %c0_3 = arith.constant 0 : index
    %c0_4 = arith.constant 0 : index
    %3 = vector.load %arg3[%c0_3, %c0_4] : memref<128x1xf32, #tpu.memory_space<vmem>>, vector<128x1xf32>
    %4 = vector.broadcast %3 : vector<128x1xf32> to vector<128x16xf32>
    %5 = arith.addf %2, %4 : vector<128x16xf32>
    %cst_5 = arith.constant 0.000000e+00 : f32
    %6 = vector.broadcast %cst_5 : f32 to vector<128x16xf32>
    %7 = arith.cmpf ogt, %5, %6 : vector<128x16xf32>
    %cst_6 = arith.constant 0.00999999977 : f32
    %8 = vector.broadcast %cst_6 : f32 to vector<128x16xf32>
    %9 = arith.mulf %8, %5 : vector<128x16xf32>
    %10 = arith.select %7, %5, %9 : vector<128x16xi1>, vector<128x16xf32>
    %11 = arith.truncf %10 : vector<128x16xf32> to vector<128x16xbf16>
    %c0_7 = arith.constant 0 : index
    %c0_8 = arith.constant 0 : index
    %12 = vector.load %arg4[%c0_7, %c0_8] : memref<128x128xbf16, #tpu.memory_space<vmem>>, vector<128x128xbf16>
    %cst_9 = arith.constant dense<0.000000e+00> : vector<128x16xf32>
    %13 = tpu.matmul %12, %11, %cst_9 {dimension_numbers = #tpu.dot_dimension_numbers<[1], [0], [0], [1], [0, 0, 1, 1], [], []>} : vector<128x128xbf16>, vector<128x16xbf16>, vector<128x16xf32> -> vector<128x16xf32>
    %c0_10 = arith.constant 0 : index
    %c0_11 = arith.constant 0 : index
    %14 = vector.load %arg5[%c0_10, %c0_11] : memref<128x1xf32, #tpu.memory_space<vmem>>, vector<128x1xf32>
    %15 = vector.broadcast %14 : vector<128x1xf32> to vector<128x16xf32>
    %16 = arith.addf %13, %15 : vector<128x16xf32>
    %cst_12 = arith.constant 0.000000e+00 : f32
    %17 = vector.broadcast %cst_12 : f32 to vector<128x16xf32>
    %18 = arith.cmpf ogt, %16, %17 : vector<128x16xf32>
    %cst_13 = arith.constant 0.00999999977 : f32
    %19 = vector.broadcast %cst_13 : f32 to vector<128x16xf32>
    %20 = arith.mulf %19, %16 : vector<128x16xf32>
    %21 = arith.select %18, %16, %20 : vector<128x16xi1>, vector<128x16xf32>
    %22 = arith.truncf %21 : vector<128x16xf32> to vector<128x16xbf16>
    %c0_14 = arith.constant 0 : index
    %c0_15 = arith.constant 0 : index
    %23 = vector.load %arg6[%c0_14, %c0_15] : memref<128x128xbf16, #tpu.memory_space<vmem>>, vector<128x128xbf16>
    %cst_16 = arith.constant dense<0.000000e+00> : vector<128x16xf32>
    %24 = tpu.matmul %23, %22, %cst_16 {dimension_numbers = #tpu.dot_dimension_numbers<[1], [0], [0], [1], [0, 0, 1, 1], [], []>} : vector<128x128xbf16>, vector<128x16xbf16>, vector<128x16xf32> -> vector<128x16xf32>
    %c0_17 = arith.constant 0 : index
    %c0_18 = arith.constant 0 : index
    %25 = vector.load %arg7[%c0_17, %c0_18] : memref<128x1xf32, #tpu.memory_space<vmem>>, vector<128x1xf32>
    %26 = vector.broadcast %25 : vector<128x1xf32> to vector<128x16xf32>
    %27 = arith.addf %24, %26 : vector<128x16xf32>
    %cst_19 = arith.constant 0.000000e+00 : f32
    %28 = vector.broadcast %cst_19 : f32 to vector<128x16xf32>
    %29 = arith.cmpf ogt, %27, %28 : vector<128x16xf32>
    %cst_20 = arith.constant 0.00999999977 : f32
    %30 = vector.broadcast %cst_20 : f32 to vector<128x16xf32>
    %31 = arith.mulf %30, %27 : vector<128x16xf32>
    %32 = arith.select %29, %27, %31 : vector<128x16xi1>, vector<128x16xf32>
    %33 = arith.truncf %32 : vector<128x16xf32> to vector<128x16xbf16>
    %c0_21 = arith.constant 0 : index
    %c0_22 = arith.constant 0 : index
    %34 = vector.load %arg8[%c0_21, %c0_22] : memref<128x1xbf16, #tpu.memory_space<vmem>>, vector<128x1xbf16>
    %35 = arith.extf %34 : vector<128x1xbf16> to vector<128x1xf32>
    %36 = arith.extf %33 : vector<128x16xbf16> to vector<128x16xf32>
    %37 = vector.broadcast %35 : vector<128x1xf32> to vector<128x16xf32>
    %38 = arith.mulf %36, %37 : vector<128x16xf32>
    %cst_23 = arith.constant dense<0.000000e+00> : vector<16xf32>
    %39 = vector.multi_reduction <add>, %38, %cst_23 [0] : vector<128x16xf32> to vector<16xf32>
    %40 = vector.shape_cast %39 : vector<16xf32> to vector<1x16xf32>
    %c0_24 = arith.constant 0 : index
    %c0_25 = arith.constant 0 : index
    %41 = vector.load %arg9[%c0_24, %c0_25] : memref<1x1xf32, #tpu.memory_space<vmem>>, vector<1x1xf32>
    %42 = vector.broadcast %41 : vector<1x1xf32> to vector<1x16xf32>
    %43 = arith.addf %40, %42 : vector<1x16xf32>
    %c0_26 = arith.constant 0 : index
    %c0_27 = arith.constant 0 : index
    %44 = vector.load %arg10[%c0_26, %c0_27] : memref<1x16xf32, #tpu.memory_space<vmem>>, vector<1x16xf32>
    tpu.vector_store %arg10[%c0_26, %c0_27], %43 {strides = array<i32>} : memref<1x16xf32, #tpu.memory_space<vmem>>, vector<1x16xf32>,
    return
  }
  func.func @transform_0(%arg0: i32) -> (i32, i32) {
    %c0_i32 = arith.constant 0 : i32
    %c0_i32_0 = arith.constant 0 : i32
    return %c0_i32, %arg0 : i32, i32
  }
  func.func @transform_1(%arg0: i32) -> (i32, i32) {
    %c0_i32 = arith.constant 0 : i32
    %c0_i32_0 = arith.constant 0 : i32
    %c0_i32_1 = arith.constant 0 : i32
    return %c0_i32, %c0_i32_0 : i32, i32
  }
  func.func @transform_2(%arg0: i32) -> (i32, i32) {
    %c0_i32 = arith.constant 0 : i32
    %c0_i32_0 = arith.constant 0 : i32
    %c0_i32_1 = arith.constant 0 : i32
    return %c0_i32, %c0_i32_0 : i32, i32
  }
  func.func @transform_3(%arg0: i32) -> (i32, i32) {
    %c0_i32 = arith.constant 0 : i32
    %c0_i32_0 = arith.constant 0 : i32
    %c0_i32_1 = arith.constant 0 : i32
    return %c0_i32, %c0_i32_0 : i32, i32
  }
  func.func @transform_4(%arg0: i32) -> (i32, i32) {
    %c0_i32 = arith.constant 0 : i32
    %c0_i32_0 = arith.constant 0 : i32
    %c0_i32_1 = arith.constant 0 : i32
    return %c0_i32, %c0_i32_0 : i32, i32
  }
  func.func @transform_5(%arg0: i32) -> (i32, i32) {
    %c0_i32 = arith.constant 0 : i32
    %c0_i32_0 = arith.constant 0 : i32
    %c0_i32_1 = arith.constant 0 : i32
    return %c0_i32, %c0_i32_0 : i32, i32
  }
  func.func @transform_6(%arg0: i32) -> (i32, i32) {
    %c0_i32 = arith.constant 0 : i32
    %c0_i32_0 = arith.constant 0 : i32
    %c0_i32_1 = arith.constant 0 : i32
    return %c0_i32, %c0_i32_0 : i32, i32
  }
  func.func @transform_7(%arg0: i32) -> (i32, i32) {
    %c0_i32 = arith.constant 0 : i32
    %c0_i32_0 = arith.constant 0 : i32
    %c0_i32_1 = arith.constant 0 : i32
    return %c0_i32, %c0_i32_0 : i32, i32
  }
  func.func @transform_8(%arg0: i32) -> (i32, i32) {
    %c0_i32 = arith.constant 0 : i32
    %c0_i32_0 = arith.constant 0 : i32
    %c0_i32_1 = arith.constant 0 : i32
    return %c0_i32, %c0_i32_0 : i32, i32
  }
  func.func @transform_9(%arg0: i32) -> (i32, i32) {
    %c0_i32 = arith.constant 0 : i32
    %c0_i32_0 = arith.constant 0 : i32
    return %c0_i32, %arg0 : i32, i32
  }
}

</mosaic_0001>

<bundles_post_ra>
// kernel: tpu_custom_call.1
= control target key start
LH: loop header
LB: loop body
LE: loop exit
PB: predicated region body
PF: predicated region fallthrough
CT: control target
= control target key end

     0   :  { %s1855_s0 = inlined_call_operand.vmem [shape: bf16[32,16], index: 0, kind: input, shape index: {}]   ;;  %s1856_s1 = inlined_call_operand.vmem [shape: bf16[128,32], index: 1, kind: input, shape index: {}]   ;;  %s1857_s2 = inlined_call_operand.vmem [shape: f32[128,1], index: 2, kind: input, shape index: {}]   ;;  %s1858_s3 = inlined_call_operand.vmem [shape: bf16[128,128], index: 3, kind: input, shape index: {}]   ;;  %s1859_s4 = inlined_call_operand.vmem [shape: f32[128,1], index: 4, kind: input, shape index: {}]   ;;  %s1860_s5 = inlined_call_operand.vmem [shape: bf16[128,128], index: 5, kind: input, shape index: {}]   ;;  %s1861_s6 = inlined_call_operand.vmem [shape: f32[128,1], index: 6, kind: input, shape index: {}]   ;;  %s1862_s7 = inlined_call_operand.vmem [shape: bf16[128,1], index: 7, kind: input, shape index: {}]   ;;  %s1863_s8 = inlined_call_operand.<no memory space> [shape: f32[1,1], index: 8, kind: input, shape index: {}]   ;;  %s1864_s9 = inlined_call_operand.hbm [shape: f32[1,16], index: 9, kind: output, shape index: {}]  }
   0x1   :  { %v14_v0 = vstv %s1863_s8 }
   0x2   :  { %15 = vst [vmem:[#allocation2] sm:$0x1] %v14_v0 }
   0x3   :  { %v58_v1 = vld [vmem:[%s1857_s2 + $0x10] sm:$0xff]  ;;  %v56_v2 = vld [vmem:[%s1857_s2] sm:$0xff]  ;;  %v1495_v3 = vmov 0   ;;  %v59_v5 = vld [vmem:[%s1857_s2 + $0x18] sm:$0xff]  ;;  %vm204_vm0 = vcmask 261120  }
   0x4   :  { %1419 = vset.pattern.permute.xlu1 %v1495_v3  ;;  %1418 = vset.pattern.permute.xlu0 %v1495_v3  ;;  %v1445_v4 = vld [vmem:[%s1855_s0] sm:$0xff]   ;;  %v57_v6 = vld [vmem:[%s1857_s2 + $0x8] sm:$0xff]  ;;  %v1449_v12 = vld [vmem:[%s1856_s1 + $0x10] sm:$0xff]  }
   0x5   :  { %84 = vperm.xlu1 %1419, %v58_v1   ;;  %74 = vperm.xlu0 %1418, %v56_v2   ;;  %v1446_v7 = vld [vmem:[%s1855_s0 + $0x8] sm:$0xff]   ;;  %v1447_v8 = vld [vmem:[%s1856_s1] sm:$0xff]   ;;  %v63_v13 = vld [vmem:[%s1857_s2 + $0x38] sm:$0xff] }
   0x6   :  { %1332 = vmatprep.subr.bf16.mxu0 %v1445_v4  ;;  %v61_v9 = vld [vmem:[%s1857_s2 + $0x28] sm:$0xff]  ;;  %v60_v10 = vld [vmem:[%s1857_s2 + $0x20] sm:$0xff]  ;;  %1336 = vmatprep.mubr.msk.bf16.mxu0 %vm204_vm0, %v1447_v8  ;;  %v62_v14 = vld [vmem:[%s1857_s2 + $0x30] sm:$0xff] }
   0x7   :  { %1333 = vmatpush3.bf16.msra.mxu0 %v1445_v4  ;;  %v1448_v11 = vld [vmem:[%s1856_s1 + $0x8] sm:$0xff]   ;;  %v64_v16 = vld [vmem:[%s1857_s2 + $0x40] sm:$0xff]  ;;  %v1450_v17 = vld [vmem:[%s1856_s1 + $0x18] sm:$0xff]  }
   0x8   :  { %1334 = vmatprep.subr.bf16.mxu0 %v1446_v7  ;;  %v65_v15 = vld [vmem:[%s1857_s2 + $0x48] sm:$0xff]  ;;  %v1451_v18 = vld [vmem:[%s1856_s1 + $0x20] sm:$0xff]   ;;  %v67_v19 = vld [vmem:[%s1857_s2 + $0x58] sm:$0xff] }
   0x9   :  { %89 = vperm.xlu1 %1419, %v59_v5   ;;  %79 = vperm.xlu0 %1418, %v57_v6   ;;  %v66_v20 = vld [vmem:[%s1857_s2 + $0x50] sm:$0xff]  ;;  %v69_v21 = vld [vmem:[%s1857_s2 + $0x68] sm:$0xff]  ;;  %v68_v22 = vld [vmem:[%s1857_s2 + $0x60] sm:$0xff] }
   0xa   :  { %v1452_v23 = vld [vmem:[%s1856_s1 + $0x28] sm:$0xff]   ;;  %v1453_v24 = vld [vmem:[%s1856_s1 + $0x30] sm:$0xff]   ;;  %v71_v25 = vld [vmem:[%s1857_s2 + $0x78] sm:$0xff] }
   0xb   :  { %1335 = vmatpush3.bf16.msra.mxu0 %v1446_v7  ;;  %v70_v26 = vld [vmem:[%s1857_s2 + $0x70] sm:$0xff]  ;;  %v399_v27 = vld [vmem:[%s1859_s4 + $0x8] sm:$0xff]  ;;  %v398_v28 = vld [vmem:[%s1859_s4] sm:$0xff] }
   0xc   :  { %v1454_v29 = vld [vmem:[%s1856_s1 + $0x38] sm:$0xff]   ;;  %v400_v31 = vld [vmem:[%s1859_s4 + $0x10] sm:$0xff]  ;;  %v403_v32 = vld [vmem:[%s1859_s4 + $0x28] sm:$0xff] }
   0xd   :  { %99 = vperm.xlu1 %1419, %v61_v9   ;;  %94 = vperm.xlu0 %1418, %v60_v10   ;;  %v401_v30 = vld [vmem:[%s1859_s4 + $0x18] sm:$0xff]  ;;  %v402_v33 = vld [vmem:[%s1859_s4 + $0x20] sm:$0xff] }
   0xe   :  { %1337 = vmatmul.mubr.msk.bf16.vlgmr.msra.gmra.mrb[0].mxu0 %vm204_vm0, %v1448_v11 }
   0xf   :  { %1340 = vmatprep.mubr.msk.bf16.mxu0 %vm204_vm0, %v1449_v12 }
  0x11   :  { %109 = vperm.xlu1 %1419, %v63_v13   ;;  %104 = vperm.xlu0 %1418, %v62_v14  }
  0x15   :  { %119 = vperm.xlu1 %1419, %v65_v15   ;;  %114 = vperm.xlu0 %1418, %v64_v16  }
  0x16   :  { %1341 = vmatmul.mubr.msk.bf16.gmra.mrb[4].mxu0 %vm204_vm0, %v1450_v17 }
  0x17   :  { %1344 = vmatprep.mubr.msk.bf16.mxu0 %vm204_vm0, %v1451_v18 }
  0x19   :  { %129 = vperm.xlu1 %1419, %v67_v19   ;;  %124 = vperm.xlu0 %1418, %v66_v20  }
  0x1d   :  { %139 = vperm.xlu1 %1419, %v69_v21   ;;  %134 = vperm.xlu0 %1418, %v68_v22  }
  0x1e   :  { %1345 = vmatmul.mubr.msk.bf16.gmra.mrb[8].mxu0 %vm204_vm0, %v1452_v23 }
  0x1f   :  { %1348 = vmatprep.mubr.msk.bf16.mxu0 %vm204_vm0, %v1453_v24 }
  0x21   :  { %149 = vperm.xlu1 %1419, %v71_v25   ;;  %144 = vperm.xlu0 %1418, %v70_v26  }
  0x25   :  { %421 = vperm.xlu1 %1419, %v399_v27   ;;  %416 = vperm.xlu0 %1418, %v398_v28  }
  0x26   :  { %1349 = vmatmul.mubr.msk.bf16.gmra.mrb[12].mxu0 %vm204_vm0, %v1454_v29 }
  0x29   :  { %431 = vperm.xlu1 %1419, %v401_v30   ;;  %426 = vperm.xlu0 %1418, %v400_v31  }
  0x2a   :  { %16 = vsyncpa [#allocation4], 0  ;;  %v405_v34 = vld [vmem:[%s1859_s4 + $0x38] sm:$0xff]  ;;  %v404_v35 = vld [vmem:[%s1859_s4 + $0x30] sm:$0xff] }
  0x2b   :  { %v407_v36 = vld [vmem:[%s1859_s4 + $0x48] sm:$0xff]  ;;  %v406_v37 = vld [vmem:[%s1859_s4 + $0x40] sm:$0xff]  ;;  %v409_v38 = vld [vmem:[%s1859_s4 + $0x58] sm:$0xff] }
  0x2c   :  { %v408_v39 = vld [vmem:[%s1859_s4 + $0x50] sm:$0xff]  ;;  %v411_v40 = vld [vmem:[%s1859_s4 + $0x68] sm:$0xff]  ;;  %v410_v41 = vld [vmem:[%s1859_s4 + $0x60] sm:$0xff] }
  0x2d   :  { %441 = vperm.xlu1 %1419, %v403_v32   ;;  %436 = vperm.xlu0 %1418, %v402_v33   ;;  %v413_v42 = vld [vmem:[%s1859_s4 + $0x78] sm:$0xff]  ;;  %v412_v43 = vld [vmem:[%s1859_s4 + $0x70] sm:$0xff]  ;;  %v712_v44 = vld [vmem:[%s1861_s6 + $0x8] sm:$0xff] }
  0x2e   :  { %v711_v45 = vld [vmem:[%s1861_s6] sm:$0xff]  ;;  %v714_v46 = vld [vmem:[%s1861_s6 + $0x18] sm:$0xff]  ;;  %v713_v47 = vld [vmem:[%s1861_s6 + $0x10] sm:$0xff] }
  0x2f   :  { %v1252_v48 = vld [vmem:[%s1862_s7] sm:$0xff]   ;;  %v716_v51 = vld [vmem:[%s1861_s6 + $0x28] sm:$0xff]  ;;  %v717_v57 = vld [vmem:[%s1861_s6 + $0x30] sm:$0xff] }
  0x30   :  { %v1253_v49 = vunpack.c.l.bf16 %v1252_v48  ;;  %v1254_v50 = vunpack.c.h.bf16 %v1252_v48  ;;  %v715_v52 = vld [vmem:[%s1861_s6 + $0x20] sm:$0xff]  ;;  %v1283_v53 = vld [vmem:[%s1862_s7 + $0x8] sm:$0xff]   ;;  %v718_v59 = vld [vmem:[%s1861_s6 + $0x38] sm:$0xff] }
  0x31   :  { %451 = vperm.xlu1 %1419, %v405_v34   ;;  %446 = vperm.xlu0 %1418, %v404_v35   ;;  %v1257_v55 = vunpack.c.l.bf16 %v1283_v53  ;;  %v1258_v56 = vunpack.c.h.bf16 %v1283_v53  ;;  %v1284_v60 = vld [vmem:[%s1862_s7 + $0x10] sm:$0xff]   ;;  %v720_v63 = vld [vmem:[%s1861_s6 + $0x48] sm:$0xff]  ;;  %v719_v0 = vld [vmem:[%s1861_s6 + $0x40] sm:$0xff] }
  0x32   :  { %v1420_v54 = vpack.i.bf16 %v1254_v50, %v1253_v49  ;;  %v1261_v61 = vunpack.c.l.bf16 %v1284_v60  ;;  %v1262_v62 = vunpack.c.h.bf16 %v1284_v60  ;;  %v1285_v1 = vld [vmem:[%s1862_s7 + $0x18] sm:$0xff]   ;;  %v721_v5 = vld [vmem:[%s1861_s6 + $0x50] sm:$0xff]  ;;  %v1286_v8 = vld [vmem:[%s1862_s7 + $0x20] sm:$0xff]  }
  0x33   :  { %v1425_v58 = vpack.i.bf16 %v1258_v56, %v1257_v55  ;;  %v1265_v3 = vunpack.c.l.bf16 %v1285_v1  ;;  %v1266_v4 = vunpack.c.h.bf16 %v1285_v1  ;;  %v722_v7 = vld [vmem:[%s1861_s6 + $0x58] sm:$0xff]  ;;  %v1269_v9 = vunpack.c.l.bf16 %v1286_v8  ;;  %v724_v11 = vld [vmem:[%s1861_s6 + $0x68] sm:$0xff]  ;;  %v723_v12 = vld [vmem:[%s1861_s6 + $0x60] sm:$0xff] }
  0x34   :  { %v1430_v2 = vpack.i.bf16 %v1262_v62, %v1261_v61  ;;  %v1270_v10 = vunpack.c.h.bf16 %v1286_v8  ;;  %v725_v14 = vld [vmem:[%s1861_s6 + $0x70] sm:$0xff]  ;;  %v1287_v15 = vld [vmem:[%s1862_s7 + $0x28] sm:$0xff]   ;;  %v726_v17 = vld [vmem:[%s1861_s6 + $0x78] sm:$0xff] }
  0x35   :  { %461 = vperm.xlu1 %1419, %v407_v36   ;;  %456 = vperm.xlu0 %1418, %v406_v37   ;;  %v1435_v6 = vpack.i.bf16 %v1266_v4, %v1265_v3  ;;  %v1273_v16 = vunpack.c.l.bf16 %v1287_v15  ;;  %v1288_v18 = vld [vmem:[%s1862_s7 + $0x30] sm:$0xff]   ;;  %v1274_v20 = vunpack.c.h.bf16 %v1287_v15  ;;  %v1289_v21 = vld [vmem:[%s1862_s7 + $0x38] sm:$0xff]   ;;  %v1190_v25 = vld [vmem:[#allocation2] sm:$0x1] }
  0x36   :  { %v1440_v13 = vpack.i.bf16 %v1270_v10, %v1269_v9  ;;  %v1277_v19 = vunpack.c.l.bf16 %v1288_v18  ;;  %v1281_v22 = vunpack.c.l.bf16 %v1289_v21  ;;  %v1278_v23 = vunpack.c.h.bf16 %v1288_v18  ;;  %v1455_v26 = vld [vmem:[%s1858_s3] sm:$0xff]  }
  0x37   :  { %v1282_v24 = vunpack.c.h.bf16 %v1289_v21  ;;  %1368 = vmatprep.mubr.bf16.mxu1 %v1455_v26 }
  0x39   :  { %471 = vperm.xlu1 %1419, %v409_v38   ;;  %466 = vperm.xlu0 %1418, %v408_v39  }
  0x3d   :  { %481 = vperm.xlu1 %1419, %v411_v40   ;;  %476 = vperm.xlu0 %1418, %v410_v41  }
  0x41   :  { %491 = vperm.xlu1 %1419, %v413_v42   ;;  %486 = vperm.xlu0 %1418, %v412_v43  }
  0x45   :  { %734 = vperm.xlu1 %1419, %v712_v44   ;;  %729 = vperm.xlu0 %1418, %v711_v45  }
  0x49   :  { %744 = vperm.xlu1 %1419, %v714_v46   ;;  %739 = vperm.xlu0 %1418, %v713_v47  }
  0x4d   :  { %754 = vperm.xlu1 %1419, %v716_v51   ;;  %749 = vperm.xlu0 %1418, %v715_v52  }
  0x51   :  { %759 = vperm.xlu1 %1419, %v717_v57   ;;  %1421 = vperm.xlu0 %1418, %v1420_v54  }
  0x55   :  { %1426 = vperm.xlu1 %1419, %v1425_v58   ;;  %764 = vperm.xlu0 %1418, %v718_v59  }
  0x59   :  { %774 = vperm.xlu1 %1419, %v720_v63   ;;  %769 = vperm.xlu0 %1418, %v719_v0  }
  0x5d   :  { %779 = vperm.xlu1 %1419, %v721_v5   ;;  %1431 = vperm.xlu0 %1418, %v1430_v2  }
  0x61   :  { %1436 = vperm.xlu1 %1419, %v1435_v6   ;;  %784 = vperm.xlu0 %1418, %v722_v7  }
  0x65   :  { %794 = vperm.xlu1 %1419, %v724_v11   ;;  %789 = vperm.xlu0 %1418, %v723_v12  }
  0x69   :  { %799 = vperm.xlu1 %1419, %v725_v14   ;;  %1441 = vperm.xlu0 %1418, %v1440_v13  }
  0x6d   :  { %1108 = vperm.xlu1 %1419, %v1273_v16   ;;  %804 = vperm.xlu0 %1418, %v726_v17  }
  0x71   :  { %1118 = vperm.xlu1 %1419, %v1277_v19   ;;  %1113 = vperm.xlu0 %1418, %v1274_v20  }
  0x75   :  { %1128 = vperm.xlu1 %1419, %v1281_v22   ;;  %1123 = vperm.xlu0 %1418, %v1278_v23  }
  0x79   :  { %1193 = vperm.xlu1 %1419, %v1190_v25   ;;  %1133 = vperm.xlu0 %1418, %v1282_v24  }
  0x84   :  { %v75_v27 = vpop.permute.xlu0 %74  ;;  %v85_v28 = vpop.permute.xlu1 %84 }
  0x88   :  { %v80_v29 = vpop.permute.xlu0 %79  ;;  %v90_v30 = vpop.permute.xlu1 %89 }
  0x8c   :  { %v95_v31 = vpop.permute.xlu0 %94  ;;  %v100_v32 = vpop.permute.xlu1 %99 }
  0x90   :  { %v105_v33 = vpop.permute.xlu0 %104  ;;  %v110_v37 = vpop.permute.xlu1 %109 }
  0x94   :  { %v115_v46 = vpop.permute.xlu0 %114  ;;  %v120_v50 = vpop.permute.xlu1 %119 }
  0x98   :  { %v125_v62 = vpop.permute.xlu0 %124  ;;  %v130_v3 = vpop.permute.xlu1 %129 }
  0x9c   :  { %v135_v13 = vpop.permute.xlu0 %134  ;;  %v140_v19 = vpop.permute.xlu1 %139 }
  0xe1   :  { %v1338_v34 = vpop.f32.mrb[0].mxu0 }
  0xe2   :  { %v272_v35 = vadd.f32 %v1338_v34, %v85_v28  ;;  %v263_v36 = vpop.f32.mrb[1].mxu0  ;;  %v150_v34 = vpop.permute.xlu1 %149 }
  0xe3   :  { %v264_v38 = vadd.f32 %v263_v36, %v75_v27  ;;  %v1339_v39 = vpop.f32.mrb[2].mxu0  ;;  %v145_v27 = vpop.permute.xlu0 %144 }
  0xe4   :  { %v344_v40 = vmul.f32 0.01, %v272_v35  ;;  %v275_v41 = vadd.f32 %v1339_v39, %v90_v30  ;;  %vm328_vm1 = vcmp.gt.f32.partialorder %v272_v35, 0.0  ;;  %v266_v42 = vpop.f32.mrb[3].mxu0 }
  0xe5   :  { %v342_v43 = vmul.f32 0.01, %v264_v38  ;;  %v267_v45 = vadd.f32 %v266_v42, %v80_v29  ;;  %vm326_vm3 = vcmp.gt.f32.partialorder %v264_v38, 0.0 }
  0xe6   :  { %vm329_vm2 = vcmp.gt.f32.partialorder %v275_v41, 0.0  ;;  %v345_v44 = vmul.f32 0.01, %v275_v41  ;;  %v360_v48 = vsel %vm328_vm1, %v272_v35, %v344_v40 }
  0xe7   :  { %v343_v47 = vmul.f32 0.01, %v267_v45  ;;  %vm327_vm4 = vcmp.gt.f32.partialorder %v267_v45, 0.0  ;;  %v358_v55 = vsel %vm326_vm3, %v264_v38, %v342_v43 }
  0xe8   :  { %v361_v49 = vsel %vm329_vm2, %v275_v41, %v345_v44 }
  0xe9   :  { %v1342_v51 = vpop.f32.mrb[4].mxu0  ;;  %v375_v52 = vpack.c.bf16 %v361_v49, %v360_v48  ;;  %v359_v56 = vsel %vm327_vm4, %v267_v45, %v343_v47 }
  0xea   :  { %v288_v53 = vadd.f32 %v1342_v51, %v105_v33  ;;  %v279_v54 = vpop.f32.mrb[5].mxu0  ;;  %v374_v59 = vpack.c.bf16 %v359_v56, %v358_v55  ;;  %v1456_v51 = vld [vmem:[%s1858_s3 + $0x8] sm:$0xff]   ;;  %v1461_v56 = vld [vmem:[%s1858_s3 + $0x30] sm:$0xff]  }
  0xeb   :  { %v280_v57 = vadd.f32 %v279_v54, %v95_v31  ;;  %v1343_v58 = vpop.f32.mrb[6].mxu0  ;;  %v1459_v54 = vld [vmem:[%s1858_s3 + $0x20] sm:$0xff]   ;;  %v1460_v55 = vld [vmem:[%s1858_s3 + $0x28] sm:$0xff]  }
  0xec   :  { %v348_v60 = vmul.f32 0.01, %v288_v53  ;;  %v291_v61 = vadd.f32 %v1343_v58, %v110_v37  ;;  %vm332_vm5 = vcmp.gt.f32.partialorder %v288_v53, 0.0  ;;  %v282_v63 = vpop.f32.mrb[7].mxu0  ;;  %1352 = vmatprep.subr.bf16.mxu1 %v374_v59  ;;  %v1463_v58 = vld [vmem:[%s1860_s5] sm:$0xff]  }
  0xed   :  { %v346_v0 = vmul.f32 0.01, %v280_v57  ;;  %v283_v2 = vadd.f32 %v282_v63, %v100_v32  ;;  %1353 = vmatpush3.bf16.msra.mxu1 %v374_v59  ;;  %vm330_vm7 = vcmp.gt.f32.partialorder %v280_v57, 0.0  ;;  %1400 = vmatprep.mubr.bf16.mxu0 %v1463_v58  ;;  %v417_v59 = vpop.permute.xlu0 %416 }
  0xee   :  { %vm333_vm6 = vcmp.gt.f32.partialorder %v291_v61, 0.0  ;;  %v349_v1 = vmul.f32 0.01, %v291_v61  ;;  %1354 = vmatprep.subr.bf16.mxu1 %v375_v52  ;;  %v364_v5 = vsel %vm332_vm5, %v288_v53, %v348_v60  ;;  %v1458_v53 = vld [vmem:[%s1858_s3 + $0x18] sm:$0xff]   ;;  %v422_v60 = vpop.permute.xlu1 %421 }
  0xef   :  { %vm331_vm8 = vcmp.gt.f32.partialorder %v283_v2, 0.0  ;;  %v347_v4 = vmul.f32 0.01, %v283_v2  ;;  %v362_v11 = vsel %vm330_vm7, %v280_v57, %v346_v0  ;;  %v1462_v57 = vld [vmem:[%s1858_s3 + $0x38] sm:$0xff]  }
  0xf0   :  { %v365_v6 = vsel %vm333_vm6, %v291_v61, %v349_v1 }
  0xf1   :  { %v1346_v7 = vpop.f32.mrb[8].mxu0  ;;  %v377_v8 = vpack.c.bf16 %v365_v6, %v364_v5  ;;  %1355 = vmatpush3.bf16.msra.mxu1 %v375_v52  ;;  %v363_v12 = vsel %vm331_vm8, %v283_v2, %v347_v4  ;;  %v1457_v52 = vld [vmem:[%s1858_s3 + $0x10] sm:$0xff]   ;;  %v427_v61 = vpop.permute.xlu0 %426 }
  0xf2   :  { %v304_v9 = vadd.f32 %v1346_v7, %v125_v62  ;;  %v295_v10 = vpop.f32.mrb[9].mxu0  ;;  %v376_v16 = vpack.c.bf16 %v363_v12, %v362_v11  ;;  %v432_v62 = vpop.permute.xlu1 %431 }
  0xf3   :  { %v296_v14 = vadd.f32 %v295_v10, %v115_v46  ;;  %v1347_v15 = vpop.f32.mrb[10].mxu0 }
  0xf4   :  { %v352_v17 = vmul.f32 0.01, %v304_v9  ;;  %v307_v18 = vadd.f32 %v1347_v15, %v130_v3  ;;  %vm336_vm9 = vcmp.gt.f32.partialorder %v304_v9, 0.0  ;;  %v298_v20 = vpop.f32.mrb[11].mxu0  ;;  %1356 = vmatprep.subr.bf16.mxu1 %v376_v16 }
  0xf5   :  { %v350_v21 = vmul.f32 0.01, %v296_v14  ;;  %v299_v23 = vadd.f32 %v298_v20, %v120_v50  ;;  %1357 = vmatpush3.bf16.msra.mxu1 %v376_v16  ;;  %vm334_vm11 = vcmp.gt.f32.partialorder %v296_v14, 0.0  ;;  %v437_v63 = vpop.permute.xlu0 %436 }
  0xf6   :  { %vm337_vm10 = vcmp.gt.f32.partialorder %v307_v18, 0.0  ;;  %v353_v22 = vmul.f32 0.01, %v307_v18  ;;  %1358 = vmatprep.subr.bf16.mxu1 %v377_v8  ;;  %v368_v25 = vsel %vm336_vm9, %v304_v9, %v352_v17  ;;  %v442_v0 = vpop.permute.xlu1 %441 }
  0xf7   :  { %vm335_vm12 = vcmp.gt.f32.partialorder %v299_v23, 0.0  ;;  %v351_v24 = vmul.f32 0.01, %v299_v23  ;;  %v366_v32 = vsel %vm334_vm11, %v296_v14, %v350_v21 }
  0xf8   :  { %v369_v26 = vsel %vm337_vm10, %v307_v18, %v353_v22 }
  0xf9   :  { %v1350_v28 = vpop.f32.mrb[12].mxu0  ;;  %v379_v29 = vpack.c.bf16 %v369_v26, %v368_v25  ;;  %1359 = vmatpush3.bf16.msra.mxu1 %v377_v8  ;;  %v367_v33 = vsel %vm335_vm12, %v299_v23, %v351_v24  ;;  %v447_v1 = vpop.permute.xlu0 %446 }
  0xfa   :  { %v320_v30 = vadd.f32 %v1350_v28, %v145_v27  ;;  %v311_v31 = vpop.f32.mrb[13].mxu0  ;;  %v378_v37 = vpack.c.bf16 %v367_v33, %v366_v32  ;;  %v452_v5 = vpop.permute.xlu1 %451 }
  0xfb   :  { %v312_v35 = vadd.f32 %v311_v31, %v135_v13  ;;  %v1351_v36 = vpop.f32.mrb[14].mxu0 }
  0xfc   :  { %v356_v38 = vmul.f32 0.01, %v320_v30  ;;  %v323_v39 = vadd.f32 %v1351_v36, %v150_v34  ;;  %v314_v40 = vpop.f32.mrb[15].mxu0  ;;  %vm340_vm13 = vcmp.gt.f32.partialorder %v320_v30, 0.0  ;;  %1360 = vmatprep.subr.bf16.mxu1 %v378_v37 }
  0xfd   :  { %v354_v41 = vmul.f32 0.01, %v312_v35  ;;  %v315_v42 = vadd.f32 %v314_v40, %v140_v19  ;;  %vm338_vm14 = vcmp.gt.f32.partialorder %v312_v35, 0.0  ;;  %1361 = vmatpush3.bf16.msra.mxu1 %v378_v37  ;;  %v457_v14 = vpop.permute.xlu0 %456 }
  0xfe   :  { %vm341_vm15 = vcmp.gt.f32.partialorder %v323_v39, 0.0  ;;  %v357_v43 = vmul.f32 0.01, %v323_v39  ;;  %1362 = vmatprep.subr.bf16.mxu1 %v379_v29  ;;  %v372_v45 = vsel %vm340_vm13, %v320_v30, %v356_v38  ;;  %v462_v18 = vpop.permute.xlu1 %461 }
  0xff   :  { %vm339_vm0 = vcmp.gt.f32.partialorder %v315_v42, 0.0  ;;  %v355_v44 = vmul.f32 0.01, %v315_v42  ;;  %v370_v47 = vsel %vm338_vm14, %v312_v35, %v354_v41 }
 0x100   :  { %v373_v46 = vsel %vm341_vm15, %v323_v39, %v357_v43 }
 0x101   :  { %v371_v48 = vsel %vm339_vm0, %v315_v42, %v355_v44  ;;  %v381_v49 = vpack.c.bf16 %v373_v46, %v372_v45  ;;  %1363 = vmatpush3.bf16.msra.mxu1 %v379_v29  ;;  %v467_v31 = vpop.permute.xlu0 %466 }
 0x102   :  { %v380_v50 = vpack.c.bf16 %v371_v48, %v370_v47  ;;  %v472_v35 = vpop.permute.xlu1 %471 }
 0x104   :  { %1364 = vmatprep.subr.bf16.mxu1 %v380_v50 }
 0x105   :  { %1365 = vmatpush3.bf16.msra.mxu1 %v380_v50  ;;  %v477_v46 = vpop.permute.xlu0 %476 }
 0x106   :  { %1366 = vmatprep.subr.bf16.mxu1 %v381_v49 }
 0x109   :  { %1367 = vmatpush3.bf16.msra.mxu1 %v381_v49 }
 0x10c   :  { %1369 = vmatmul.mubr.bf16.vlgmr.msra.gmra.mrb[0].mxu1 %v1456_v51 }
 0x10d   :  { %1372 = vmatprep.mubr.bf16.mxu1 %v1457_v52  ;;  %v482_v52 = vpop.permute.xlu1 %481 }
 0x114   :  { %1373 = vmatmul.mubr.bf16.gmra.mrb[4].mxu1 %v1458_v53 }
 0x115   :  { %1376 = vmatprep.mubr.bf16.mxu1 %v1459_v54 }
 0x11c   :  { %1377 = vmatmul.mubr.bf16.gmra.mrb[8].mxu1 %v1460_v55 }
 0x11d   :  { %1380 = vmatprep.mubr.bf16.mxu1 %v1461_v56 }
 0x124   :  { %1381 = vmatmul.mubr.bf16.gmra.mrb[12].mxu1 %v1462_v57 }
 0x1df   :  { %v1370_v2 = vpop.f32.mrb[0].mxu1 }
 0x1e0   :  { %v585_v3 = vadd.f32 %v1370_v2, %v427_v61  ;;  %v576_v4 = vpop.f32.mrb[1].mxu1 }
 0x1e1   :  { %v577_v6 = vadd.f32 %v576_v4, %v417_v59  ;;  %v1371_v7 = vpop.f32.mrb[2].mxu1  ;;  %v487_v59 = vpop.permute.xlu0 %486 }
 0x1e2   :  { %v657_v8 = vmul.f32 0.01, %v585_v3  ;;  %v588_v9 = vadd.f32 %v1371_v7, %v432_v62  ;;  %v579_v10 = vpop.f32.mrb[3].mxu1  ;;  %vm641_vm1 = vcmp.gt.f32.partialorder %v585_v3, 0.0 }
 0x1e3   :  { %v655_v11 = vmul.f32 0.01, %v577_v6  ;;  %v580_v12 = vadd.f32 %v579_v10, %v422_v60  ;;  %vm639_vm2 = vcmp.gt.f32.partialorder %v577_v6, 0.0 }
 0x1e4   :  { %vm642_vm3 = vcmp.gt.f32.partialorder %v588_v9, 0.0  ;;  %v658_v13 = vmul.f32 0.01, %v588_v9  ;;  %v673_v16 = vsel %vm641_vm1, %v585_v3, %v657_v8  ;;  %v492_v3 = vpop.permute.xlu1 %491 }
 0x1e5   :  { %vm640_vm4 = vcmp.gt.f32.partialorder %v580_v12, 0.0  ;;  %v656_v15 = vmul.f32 0.01, %v580_v12  ;;  %v671_v20 = vsel %vm639_vm2, %v577_v6, %v655_v11 }
 0x1e6   :  { %v674_v17 = vsel %vm642_vm3, %v588_v9, %v658_v13 }
 0x1e7   :  { %v1374_v19 = vpop.f32.mrb[4].mxu1  ;;  %v672_v21 = vsel %vm640_vm4, %v580_v12, %v656_v15  ;;  %v688_v22 = vpack.c.bf16 %v674_v17, %v673_v16 }
 0x1e8   :  { %v601_v23 = vadd.f32 %v1374_v19, %v447_v1  ;;  %v592_v24 = vpop.f32.mrb[5].mxu1  ;;  %v687_v25 = vpack.c.bf16 %v672_v21, %v671_v20  ;;  %v1464_v19 = vld [vmem:[%s1860_s5 + $0x8] sm:$0xff]   ;;  %v1465_v20 = vld [vmem:[%s1860_s5 + $0x10] sm:$0xff]   ;;  %v1466_v21 = vld [vmem:[%s1860_s5 + $0x18] sm:$0xff]  }
 0x1e9   :  { %v593_v26 = vadd.f32 %v592_v24, %v437_v63  ;;  %v1375_v27 = vpop.f32.mrb[6].mxu1  ;;  %v1469_v24 = vld [vmem:[%s1860_s5 + $0x30] sm:$0xff]  }
 0x1ea   :  { %v661_v28 = vmul.f32 0.01, %v601_v23  ;;  %v604_v29 = vadd.f32 %v1375_v27, %v452_v5  ;;  %v595_v30 = vpop.f32.mrb[7].mxu1  ;;  %1384 = vmatprep.subr.bf16.mxu0 %v687_v25  ;;  %vm645_vm5 = vcmp.gt.f32.partialorder %v601_v23, 0.0  ;;  %v735_v27 = vpop.permute.xlu1 %734 }
 0x1eb   :  { %v659_v32 = vmul.f32 0.01, %v593_v26  ;;  %v596_v33 = vadd.f32 %v595_v30, %v442_v0  ;;  %1385 = vmatpush3.bf16.msra.mxu0 %v687_v25  ;;  %vm643_vm6 = vcmp.gt.f32.partialorder %v593_v26, 0.0  ;;  %v1470_v25 = vld [vmem:[%s1860_s5 + $0x38] sm:$0xff]  }
 0x1ec   :  { %vm646_vm7 = vcmp.gt.f32.partialorder %v604_v29, 0.0  ;;  %v662_v34 = vmul.f32 0.01, %v604_v29  ;;  %1386 = vmatprep.subr.bf16.mxu0 %v688_v22  ;;  %v677_v37 = vsel %vm645_vm5, %v601_v23, %v661_v28  ;;  %v1468_v23 = vld [vmem:[%s1860_s5 + $0x28] sm:$0xff]   ;;  %vm1152_vm5 = vcmask 130048  }
 0x1ed   :  { %vm644_vm8 = vcmp.gt.f32.partialorder %v596_v33, 0.0  ;;  %v660_v36 = vmul.f32 0.01, %v596_v33  ;;  %v675_v40 = vsel %vm643_vm6, %v593_v26, %v659_v32  ;;  %v730_v26 = vpop.permute.xlu0 %729 }
 0x1ee   :  { %v678_v38 = vsel %vm646_vm7, %v604_v29, %v662_v34  ;;  %v745_v29 = vpop.permute.xlu1 %744 }
 0x1ef   :  { %v1378_v39 = vpop.f32.mrb[8].mxu1  ;;  %1387 = vmatpush3.bf16.msra.mxu0 %v688_v22  ;;  %v676_v41 = vsel %vm644_vm8, %v596_v33, %v660_v36  ;;  %v690_v42 = vpack.c.bf16 %v678_v38, %v677_v37  ;;  %v1467_v22 = vld [vmem:[%s1860_s5 + $0x20] sm:$0xff]   ;;  %s1496_s5 = smov [#allocation3]  }
 0x1f0   :  { %v617_v43 = vadd.f32 %v1378_v39, %v467_v31  ;;  %v608_v44 = vpop.f32.mrb[9].mxu1  ;;  %v689_v45 = vpack.c.bf16 %v676_v41, %v675_v40  ;;  %s1209_s20 = sshll.u32 %s1496_s5, 4  ;;  %s1210_s20 = int_to_ptr.vmem [resolvable:$true] %s1209_s20 }
 0x1f1   :  { %v609_v47 = vadd.f32 %v608_v44, %v457_v14  ;;  %v1379_v48 = vpop.f32.mrb[10].mxu1  ;;  %v740_v28 = vpop.permute.xlu0 %739  ;;  %s1471_s21 = scalar_lea.vmem %s1210_s20, 16  ;;  %s1475_s2 = scalar_lea.vmem %s1210_s20, 32 }
 0x1f2   :  { %v665_v49 = vmul.f32 0.01, %v617_v43  ;;  %v620_v50 = vadd.f32 %v1379_v48, %v472_v35  ;;  %v611_v51 = vpop.f32.mrb[11].mxu1  ;;  %1388 = vmatprep.subr.bf16.mxu0 %v689_v45  ;;  %vm649_vm9 = vcmp.gt.f32.partialorder %v617_v43, 0.0  ;;  %v755_v31 = vpop.permute.xlu1 %754  ;;  %p1472_p0 = scmp.ne.s32.totalorder %s1210_s20, %s1471_s21  ;;  %p1476_p1 = scmp.lt.s32.totalorder %s1210_s20, %s1210_s20 }
 0x1f3   :  { %v663_v53 = vmul.f32 0.01, %v609_v47  ;;  %v612_v54 = vadd.f32 %v611_v51, %v462_v18  ;;  %1389 = vmatpush3.bf16.msra.mxu0 %v689_v45  ;;  %vm647_vm10 = vcmp.gt.f32.partialorder %v609_v47, 0.0  ;;  %p1477_p2 = scmp.lt.s32.totalorder %s1475_s2, %s1471_s21 }
 0x1f4   :  { %vm650_vm11 = vcmp.gt.f32.partialorder %v620_v50, 0.0  ;;  %v666_v55 = vmul.f32 0.01, %v620_v50  ;;  %1390 = vmatprep.subr.bf16.mxu0 %v690_v42  ;;  %v681_v57 = vsel %vm649_vm9, %v617_v43, %v665_v49 }
 0x1f5   :  { %vm648_vm12 = vcmp.gt.f32.partialorder %v612_v54, 0.0  ;;  %v664_v56 = vmul.f32 0.01, %v612_v54  ;;  %v679_v61 = vsel %vm647_vm10, %v609_v47, %v663_v53  ;;  %v750_v30 = vpop.permute.xlu0 %749  ;;  %p1478_p3 = por %p1477_p2, %p1476_p1 }
 0x1f6   :  { %v682_v58 = vsel %vm650_vm11, %v620_v50, %v666_v55  ;;  %v760_v33 = vpop.permute.xlu1 %759 }
 0x1f7   :  { %v1382_v60 = vpop.f32.mrb[12].mxu1  ;;  %1391 = vmatpush3.bf16.msra.mxu0 %v690_v42  ;;  %v680_v62 = vsel %vm648_vm12, %v612_v54, %v664_v56  ;;  %v692_v63 = vpack.c.bf16 %v682_v58, %v681_v57  ;;  %p1479_p4 = pnand %p1478_p3, %p1472_p0 }
 0x1f8   :  { %v633_v0 = vadd.f32 %v1382_v60, %v487_v59  ;;  %v624_v1 = vpop.f32.mrb[13].mxu1  ;;  %v691_v2 = vpack.c.bf16 %v680_v62, %v679_v61 }
 0x1f9   :  { %v625_v4 = vadd.f32 %v624_v1, %v477_v46  ;;  %v1383_v5 = vpop.f32.mrb[14].mxu1  ;;  %v1422_v32 = vpop.permute.xlu0 %1421 }
 0x1fa   :  { %v669_v6 = vmul.f32 0.01, %v633_v0  ;;  %v636_v7 = vadd.f32 %v1383_v5, %v492_v3  ;;  %v627_v8 = vpop.f32.mrb[15].mxu1  ;;  %1392 = vmatprep.subr.bf16.mxu0 %v691_v2  ;;  %vm653_vm13 = vcmp.gt.f32.partialorder %v633_v0, 0.0  ;;  %v1427_v35 = vpop.permute.xlu1 %1426  ;;  %v1424_v62 = vunpack.i.h.bf16 %v1422_v32 }
 0x1fb   :  { %v667_v9 = vmul.f32 0.01, %v625_v4  ;;  %v628_v10 = vadd.f32 %v627_v8, %v482_v52  ;;  %1393 = vmatpush3.bf16.msra.mxu0 %v691_v2  ;;  %vm651_vm14 = vcmp.gt.f32.partialorder %v625_v4, 0.0  ;;  %v1423_v3 = vunpack.i.l.bf16 %v1422_v32 }
 0x1fc   :  { %vm654_vm15 = vcmp.gt.f32.partialorder %v636_v7, 0.0  ;;  %v670_v11 = vmul.f32 0.01, %v636_v7  ;;  %1394 = vmatprep.subr.bf16.mxu0 %v692_v63  ;;  %v685_v13 = vsel %vm653_vm13, %v633_v0, %v669_v6  ;;  %v1429_v8 = vunpack.i.h.bf16 %v1427_v35 }
 0x1fd   :  { %vm652_vm0 = vcmp.gt.f32.partialorder %v628_v10, 0.0  ;;  %v668_v12 = vmul.f32 0.01, %v628_v10  ;;  %v683_v15 = vsel %vm651_vm14, %v625_v4, %v667_v9  ;;  %v765_v34 = vpop.permute.xlu0 %764  ;;  %v1428_v4 = vunpack.i.l.bf16 %v1427_v35 }
 0x1fe   :  { %v686_v14 = vsel %vm654_vm15, %v636_v7, %v670_v11  ;;  %v1806_v37 = vpop.permute.xlu1 %774 }
 0x1ff   :  { %1395 = vmatpush3.bf16.msra.mxu0 %v692_v63  ;;  %v684_v16 = vsel %vm652_vm0, %v628_v10, %v668_v12  ;;  %v694_v17 = vpack.c.bf16 %v686_v14, %v685_v13 }
 0x200   :  { %v693_v18 = vpack.c.bf16 %v684_v16, %v683_v15 }
 0x201   :  { %v1804_v36 = vpop.permute.xlu0 %769 }
 0x202   :  { %1396 = vmatprep.subr.bf16.mxu0 %v693_v18  ;;  %v780_v50 = vpop.permute.xlu1 %779 }
 0x203   :  { %1397 = vmatpush3.bf16.msra.mxu0 %v693_v18 }
 0x204   :  { %1398 = vmatprep.subr.bf16.mxu0 %v694_v17 }
 0x205   :  { %v1808_v41 = vpop.permute.xlu0 %1431 }
 0x206   :  { %v1810_v9 = vpop.permute.xlu1 %1436 }
 0x207   :  { %1399 = vmatpush3.bf16.msra.mxu0 %v694_v17 }
 0x209   :  { %v785_v54 = vpop.permute.xlu0 %784 }
 0x20a   :  { %1401 = vmatmul.mubr.bf16.vlgmr.msra.gmra.mrb[16].mxu0 %v1464_v19 }
 0x20b   :  { %1404 = vmatprep.mubr.bf16.mxu0 %v1465_v20 }
 0x20d   :  { %v1812_v15 = vpop.permute.xlu0 %789 }
 0x212   :  { %1405 = vmatmul.mubr.bf16.gmra.mrb[20].mxu0 %v1466_v21 }
 0x213   :  { %1408 = vmatprep.mubr.bf16.mxu0 %v1467_v22 }
 0x21a   :  { %1409 = vmatmul.mubr.bf16.gmra.mrb[24].mxu0 %v1468_v23 }
 0x21b   :  { %1412 = vmatprep.mubr.bf16.mxu0 %v1469_v24 }
 0x222   :  { %1413 = vmatmul.mubr.bf16.gmra.mrb[28].mxu0 %v1470_v25 }
 0x2dd   :  { %v1402_v38 = vpop.f32.mrb[16].mxu0 }
 0x2de   :  { %v898_v39 = vadd.f32 %v1402_v38, %v740_v28  ;;  %v889_v40 = vpop.f32.mrb[17].mxu0  ;;  %v1434_v38 = vunpack.i.h.bf16 %v1808_v41 }
 0x2df   :  { %v890_v42 = vadd.f32 %v889_v40, %v730_v26  ;;  %v1403_v43 = vpop.f32.mrb[18].mxu0 }
 0x2e0   :  { %v970_v44 = vmul.f32 0.01, %v898_v39  ;;  %v901_v45 = vadd.f32 %v1403_v43, %v745_v29  ;;  %v892_v46 = vpop.f32.mrb[19].mxu0  ;;  %vm954_vm1 = vcmp.gt.f32.partialorder %v898_v39, 0.0 }
 0x2e1   :  { %v968_v47 = vmul.f32 0.01, %v890_v42  ;;  %v893_v48 = vadd.f32 %v892_v46, %v735_v27  ;;  %vm952_vm2 = vcmp.gt.f32.partialorder %v890_v42, 0.0 }
 0x2e2   :  { %vm955_vm3 = vcmp.gt.f32.partialorder %v901_v45, 0.0  ;;  %v971_v49 = vmul.f32 0.01, %v901_v45  ;;  %v986_v52 = vsel %vm954_vm1, %v898_v39, %v970_v44  ;;  %v1433_v44 = vunpack.i.l.bf16 %v1808_v41 }
 0x2e3   :  { %vm953_vm4 = vcmp.gt.f32.partialorder %v893_v48, 0.0  ;;  %v969_v51 = vmul.f32 0.01, %v893_v48  ;;  %v984_v55 = vsel %vm952_vm2, %v890_v42, %v968_v47  ;;  %vm1201_vm2 = vcmask 122880  }
 0x2e4   :  { %v987_v53 = vsel %vm955_vm3, %v901_v45, %v971_v49  ;;  %v1442_v45 = vpop.permute.xlu0 %1441 }
 0x2e5   :  { %v1001_v56 = vpack.c.bf16 %v987_v53, %v986_v52  ;;  %v985_v57 = vsel %vm953_vm4, %v893_v48, %v969_v51  ;;  %v1406_v58 = vpop.f32.mrb[20].mxu0  ;;  %v1439_v52 = vunpack.i.h.bf16 %v1810_v9 }
 0x2e6   :  { %v1000_v59 = vpack.c.bf16 %v985_v57, %v984_v55  ;;  %v914_v60 = vadd.f32 %v1406_v58, %v760_v33  ;;  %v905_v61 = vpop.f32.mrb[21].mxu0 }
 0x2e7   :  { %v1042_v63 = vunpack.c.l.bf16 %v1001_v56  ;;  %v1043_v0 = vunpack.c.h.bf16 %v1001_v56  ;;  %v906_v1 = vadd.f32 %v905_v61, %v750_v30  ;;  %v1407_v2 = vpop.f32.mrb[22].mxu0  ;;  %v1818_v30 = vpop.permute.xlu1 %794  ;;  %v1438_v56 = vunpack.i.l.bf16 %v1810_v9 }
 0x2e8   :  { %v1040_v5 = vunpack.c.l.bf16 %v1000_v59  ;;  %v1041_v6 = vunpack.c.h.bf16 %v1000_v59  ;;  %v908_v7 = vpop.f32.mrb[23].mxu0  ;;  %vm958_vm6 = vcmp.gt.f32.partialorder %v914_v60, 0.0  ;;  %v974_v10 = vmul.f32 0.01, %v914_v60 }
 0x2e9   :  { %v1138_v11 = vmul.f32 %v1428_v4, %v1042_v63  ;;  %v917_v14 = vadd.f32 %v1407_v2, %v765_v34  ;;  %v1139_v16 = vmul.f32 %v1429_v8, %v1043_v0  ;;  %vm956_vm7 = vcmp.gt.f32.partialorder %v906_v1, 0.0  ;;  %v805_v2 = vpop.permute.xlu0 %804 }
 0x2ea   :  { %v1136_v12 = vmul.f32 %v1423_v3, %v1040_v5  ;;  %v1137_v13 = vmul.f32 %v1424_v62, %v1041_v6  ;;  %v972_v17 = vmul.f32 0.01, %v906_v1  ;;  %v909_v18 = vadd.f32 %v908_v7, %v755_v31 }
 0x2eb   :  { %vm959_vm8 = vcmp.gt.f32.partialorder %v917_v14, 0.0  ;;  %v975_v21 = vmul.f32 0.01, %v917_v14  ;;  %v1156_v25 = vsel %vm1152_vm5, %v1138_v11, 0.0  ;;  %v990_v26 = vsel %vm958_vm6, %v914_v60, %v974_v10  ;;  %v800_v58 = vpop.permute.xlu1 %799 }
 0x2ec   :  { %v1153_v19 = vsel %vm1152_vm5, %v1136_v12, 0.0  ;;  %v1154_v20 = vsel %vm1152_vm5, %v1137_v13, 0.0  ;;  %vm957_vm9 = vcmp.gt.f32.partialorder %v909_v18, 0.0  ;;  %v973_v23 = vmul.f32 0.01, %v909_v18 }
 0x2ed   :  { %v1155_v22 = vadd.f32 %v1154_v20, %v1153_v19  ;;  %v1410_v24 = vpop.f32.mrb[24].mxu0  ;;  %v991_v27 = vsel %vm959_vm8, %v917_v14, %v975_v21  ;;  %v988_v32 = vsel %vm956_vm7, %v906_v1, %v972_v17  ;;  %v1158_v39 = vsel %vm1152_vm5, %v1139_v16, 0.0 }
 0x2ee   :  { %v930_v28 = vadd.f32 %v1410_v24, %v780_v50  ;;  %v921_v29 = vpop.f32.mrb[25].mxu0  ;;  %v1003_v33 = vpack.c.bf16 %v991_v27, %v990_v26  ;;  %v989_v34 = vsel %vm957_vm9, %v909_v18, %v973_v23  ;;  %v1444_v14 = vunpack.i.h.bf16 %v1442_v45  ;;  %v1114_v26 = vpop.permute.xlu0 %1113 }
 0x2ef   :  { %v1157_v31 = vadd.f32 %v1156_v25, %v1155_v22  ;;  %v1411_v35 = vpop.f32.mrb[26].mxu0  ;;  %v1002_v40 = vpack.c.bf16 %v989_v34, %v988_v32  ;;  %v922_v48 = vadd.f32 %v921_v29, %v1804_v36  ;;  %v1443_v16 = vunpack.i.l.bf16 %v1442_v45  ;;  %v1109_v19 = vpop.permute.xlu1 %1108 }
 0x2f0   :  { %v933_v42 = vadd.f32 %v1411_v35, %v785_v54  ;;  %v924_v43 = vpop.f32.mrb[27].mxu0  ;;  %v978_v47 = vmul.f32 0.01, %v930_v28  ;;  %v1046_v49 = vunpack.c.l.bf16 %v1003_v33  ;;  %vm962_vm10 = vcmp.gt.f32.partialorder %v930_v28, 0.0 }
 0x2f1   :  { %v1159_v46 = vadd.f32 %v1158_v39, %v1157_v31  ;;  %v1044_v50 = vunpack.c.l.bf16 %v1002_v40  ;;  %v1045_v51 = vunpack.c.h.bf16 %v1002_v40  ;;  %v1047_v53 = vunpack.c.h.bf16 %v1003_v33 }
 0x2f2   :  { %vm963_vm11 = vcmp.gt.f32.partialorder %v933_v42, 0.0  ;;  %v979_v55 = vmul.f32 0.01, %v933_v42  ;;  %v925_v41 = vadd.f32 %v924_v43, %v1806_v37  ;;  %v994_v59 = vsel %vm962_vm10, %v930_v28, %v978_v47 }
 0x2f3   :  { %v1140_v54 = vmul.f32 %v1433_v44, %v1044_v50  ;;  %v1141_v57 = vmul.f32 %v1434_v38, %v1045_v51  ;;  %vm960_vm12 = vcmp.gt.f32.partialorder %v922_v48, 0.0  ;;  %v976_v60 = vmul.f32 0.01, %v922_v48  ;;  %v1119_v43 = vpop.permute.xlu1 %1118 }
 0x2f4   :  { %v995_v36 = vsel %vm963_vm11, %v933_v42, %v979_v55  ;;  %v1142_v62 = vmul.f32 %v1438_v56, %v1046_v49  ;;  %vm961_vm13 = vcmp.gt.f32.partialorder %v925_v41, 0.0  ;;  %v1143_v3 = vmul.f32 %v1439_v52, %v1047_v53  ;;  %v1124_v49 = vpop.permute.xlu0 %1123 }
 0x2f5   :  { %v1414_v61 = vpop.f32.mrb[28].mxu0  ;;  %v1160_v63 = vsel %vm1152_vm5, %v1140_v54, 0.0  ;;  %v1005_v0 = vpack.c.bf16 %v995_v36, %v994_v59  ;;  %v977_v5 = vmul.f32 0.01, %v925_v41  ;;  %v1162_v37 = vsel %vm1152_vm5, %v1141_v57, 0.0 }
 0x2f6   :  { %v937_v1 = vpop.f32.mrb[29].mxu0  ;;  %v1161_v4 = vadd.f32 %v1160_v63, %v1159_v46  ;;  %v946_v6 = vadd.f32 %v1414_v61, %v800_v58  ;;  %v992_v11 = vsel %vm960_vm12, %v922_v48, %v976_v60  ;;  %v1164_v17 = vsel %vm1152_vm5, %v1142_v62, 0.0 }
 0x2f7   :  { %v1415_v7 = vpop.f32.mrb[30].mxu0  ;;  %v993_v12 = vsel %vm961_vm13, %v925_v41, %v977_v5  ;;  %v938_v13 = vadd.f32 %v937_v1, %v1812_v15  ;;  %v1166_v20 = vsel %vm1152_vm5, %v1143_v3, 0.0  ;;  %v1050_v22 = vunpack.c.l.bf16 %v1005_v0  ;;  %v1129_v59 = vpop.permute.xlu1 %1128 }
 0x2f8   :  { %v949_v8 = vadd.f32 %v1415_v7, %v805_v2  ;;  %v940_v9 = vpop.f32.mrb[31].mxu0  ;;  %v1163_v10 = vadd.f32 %v1162_v37, %v1161_v4  ;;  %v1004_v18 = vpack.c.bf16 %v993_v12, %v992_v11  ;;  %v982_v23 = vmul.f32 0.01, %v946_v6  ;;  %v1134_v62 = vpop.permute.xlu0 %1133 }
 0x2f9   :  { %vm966_vm14 = vcmp.gt.f32.partialorder %v946_v6, 0.0  ;;  %v980_v28 = vmul.f32 0.01, %v938_v13  ;;  %v941_v15 = vadd.f32 %v940_v9, %v1818_v30  ;;  %v1051_v31 = vunpack.c.h.bf16 %v1005_v0 }
 0x2fa   :  { %v1165_v21 = vadd.f32 %v1164_v17, %v1163_v10  ;;  %v1048_v24 = vunpack.c.l.bf16 %v1004_v18  ;;  %v1049_v25 = vunpack.c.h.bf16 %v1004_v18  ;;  %vm967_vm15 = vcmp.gt.f32.partialorder %v949_v8, 0.0 }
 0x2fb   :  { %v983_v29 = vmul.f32 0.01, %v949_v8  ;;  %vm964_vm0 = vcmp.gt.f32.partialorder %v938_v13, 0.0  ;;  %v998_v34 = vsel %vm966_vm14, %v946_v6, %v982_v23  ;;  %vm965_vm1 = vcmp.gt.f32.partialorder %v941_v15, 0.0 }
 0x2fc   :  { %v1167_v27 = vadd.f32 %v1166_v20, %v1165_v21  ;;  %v1144_v32 = vmul.f32 %v1443_v16, %v1048_v24  ;;  %v1145_v33 = vmul.f32 %v1444_v14, %v1049_v25  ;;  %v981_v38 = vmul.f32 0.01, %v941_v15 }
 0x2fd   :  { %v999_v35 = vsel %vm967_vm15, %v949_v8, %v983_v29  ;;  %v1146_v39 = vmul.f32 %v1109_v19, %v1050_v22  ;;  %v996_v45 = vsel %vm964_vm0, %v938_v13, %v980_v28  ;;  %v1147_v47 = vmul.f32 %v1114_v26, %v1051_v31  ;;  %v1194_v13 = vpop.permute.xlu1 %1193 }
 0x2fe   :  { %v1168_v40 = vsel %vm1152_vm5, %v1144_v32, 0.0  ;;  %v1007_v42 = vpack.c.bf16 %v999_v35, %v998_v34  ;;  %v997_v46 = vsel %vm965_vm1, %v941_v15, %v981_v38  ;;  %v1170_v48 = vsel %vm1152_vm5, %v1145_v33, 0.0 }
 0x2ff   :  { %v1169_v44 = vadd.f32 %v1168_v40, %v1167_v27  ;;  %v1006_v30 = vpack.c.bf16 %v997_v46, %v996_v45  ;;  %v1172_v51 = vsel %vm1152_vm5, %v1146_v39, 0.0  ;;  %v1174_v54 = vsel %vm1152_vm5, %v1147_v47, 0.0 }
 0x300   :  { %v1054_v52 = vunpack.c.l.bf16 %v1007_v42  ;;  %v1055_v57 = vunpack.c.h.bf16 %v1007_v42  ;;  %v1196_v6 = vlaneseq }
 0x301   :  { %v1171_v50 = vadd.f32 %v1170_v48, %v1169_v44  ;;  %v1052_v53 = vunpack.c.l.bf16 %v1006_v30  ;;  %v1053_v55 = vunpack.c.h.bf16 %v1006_v30 }
 0x302   :  { %v1150_v36 = vmul.f32 %v1129_v59, %v1054_v52  ;;  %v1151_v0 = vmul.f32 %v1134_v62, %v1055_v57  ;;  %v1197_v8 = vshrl.u32 %v1196_v6, 7 }
 0x303   :  { %v1173_v56 = vadd.f32 %v1172_v51, %v1171_v50  ;;  %v1148_v41 = vmul.f32 %v1119_v43, %v1052_v53  ;;  %v1149_v58 = vmul.f32 %v1124_v49, %v1053_v55 }
 0x304   :  { %v1180_v3 = vsel %vm1152_vm5, %v1150_v36, 0.0  ;;  %v1182_v5 = vsel %vm1152_vm5, %v1151_v0, 0.0  ;;  %v1198_v11 = vsub.s32 0, %v1197_v8 }
 0x305   :  { %v1175_v60 = vadd.f32 %v1174_v54, %v1173_v56  ;;  %v1176_v61 = vsel %vm1152_vm5, %v1148_v41, 0.0  ;;  %v1178_v1 = vsel %vm1152_vm5, %v1149_v58, 0.0 }
 0x306   :  { %v1199_v16 = vrot.slane %v1194_v13, %v1198_v11 }
 0x307   :  { %v1177_v63 = vadd.f32 %v1176_v61, %v1175_v60 }
 0x309   :  { %v1179_v2 = vadd.f32 %v1178_v1, %v1177_v63 }
 0x30b   :  { %v1181_v4 = vadd.f32 %v1180_v3, %v1179_v2 }
 0x30d   :  { %v1183_v7 = vadd.f32 %v1182_v5, %v1181_v4 }
 0x30f   :  { %v1184_v37 = vrot.slane %v1183_v7, 4 }
 0x311   :  { %v1185_v9 = vadd.f32 %v1184_v37, %v1183_v7 }
 0x313   :  { %v1186_v10 = vrot.slane %v1185_v9, 2 }
 0x315   :  { %v1187_v12 = vadd.f32 %v1186_v10, %v1185_v9 }
 0x317   :  { %v1188_v14 = vrot.slane %v1187_v12, 1 }
 0x319   :  { %v1189_v17 = vadd.f32 %v1188_v14, %v1187_v12 }
 0x31b   :  { %v1200_v18 = vadd.f32 %v1199_v16, %v1189_v17 }
 0x31d   :  { %1202 = vst.msk [vmem:[#allocation3] sm:$0x1] %vm1201_vm2, %v1200_v18 }
 0x31e   :  { %1482 = shalt.err (!%p1479_p4)
}
 0x31f   :  { %s1483_s24 = scalar_lea.hbm %s1864_s9, 16 }
 0x320   :  { %p1484_p5 = scmp.ne.s32.totalorder %s1864_s9, %s1483_s24  ;;  %p1487_p6 = scmp.lt.u32.totalorder %s1483_s24, %s1864_s9 }
 0x322   :  { %p1489_p7 = pnand %p1487_p6, %p1484_p5 }
 0x324   :  { %1492 = shalt.err (!%p1489_p7)
}
 0x325   :  { %1212 = dma.vmem_to_hbm [thread:$0]  %s1210_s20, 16, %s1864_s9, [#allocation4]  }
 0x326   :  { %1493 = dma.done.wait [#allocation4], 16  }
 0x327   :  { %1494 = vsyncadd [#allocation4], 4294967280 }
 0x328   :  { %1216 = vsyncpa [#allocation4], 1 }

</bundles_post_ra>
